<compile_context>
chip_gen: v7x
topology: tpu7x:2x2x1
jax: 0.10.0
libtpu: 0.0.40
codegen_flags: <defaults>
</compile_context>

<pallas_src>
import jax
import jax.numpy as jnp
from jax.experimental import pallas as pl
from jax.experimental.pallas import tpu as pltpu

EPS = 1e-5
K = 3      # conv kernel size
LANE = 128


def _round_up(x, m):
    return (x + m - 1) // m * m


def _choose_tile(L, max_tile=512):
    """Length tile: multiple of 16, <= max_tile; wrapper pads L up to it."""
    max_tile = max(16, max_tile - max_tile % 16)
    return min(_round_up(L, 16), max_tile)


def _fold_bn(gamma, beta, mean, var):
    scale = gamma / jnp.sqrt(var + EPS)
    shift = beta - mean * scale
    return scale.astype(jnp.float32), shift.astype(jnp.float32)


def _make_kernel(TL, L_real):
    def kernel(x_hbm, w1_ref, b1_ref, w2_ref, b2_ref, wsk_ref, bs_ref,
               o_ref, xbuf, sem):
        n = pl.program_id(0)
        t = pl.program_id(1)
        T = pl.num_programs(1)
        slot = t % 2

        def x_copy(tt, s):
            return pltpu.make_async_copy(
                x_hbm.at[n, pl.ds(tt * TL, TL + 4), :], xbuf.at[s], sem.at[s])

        # First tile of this batch row: fetch it now.  (t is sequential per
        # batch row because its grid axis is "arbitrary".)
        @pl.when(t == 0)
        def _():
            x_copy(0, 0).start()

        # Prefetch the next window into the other slot (overlaps compute).
        @pl.when(t + 1 < T)
        def _():
            x_copy(t + 1, 1 - slot).start()

        x_copy(t, slot).wait()
        xp = xbuf[slot]                                     # (TL+4, Cin_p)

        # ---- conv1 (k=3, p=1): 3 taps folded into ONE deep MXU matmul ----
        x_stk = jnp.concatenate(
            [xp[0:TL + 2], xp[1:TL + 3], xp[2:TL + 4]], axis=1)
        h = jnp.dot(x_stk, w1_ref[...], preferred_element_type=jnp.float32)
        h = jnp.maximum(h + b1_ref[...], 0.0)               # folded bn1 + relu

        # conv2's zero padding exists only outside the global [0, L) range:
        # zero h rows whose global position falls outside it (first tile's
        # left halo, last real tile's right halo and any padded-tail rows).
        row = jax.lax.broadcasted_iota(jnp.int32, (TL + 2, 1), 0)
        gpos = t * TL - 1 + row
        h = jnp.where((gpos < 0) | (gpos >= L_real), 0.0, h)
        h = h.astype(w2_ref.dtype)

        # ---- conv2 (k=3, p=1) + folded bn2, again one deep matmul ----
        h_stk = jnp.concatenate([h[0:TL], h[1:TL + 1], h[2:TL + 2]], axis=1)
        out = jnp.dot(h_stk, w2_ref[...],
                      preferred_element_type=jnp.float32) + b2_ref[...]

        # ---- skip path: 1x1 conv + folded bn (centre TL rows of window) ----
        skip = jnp.dot(xp[2:TL + 2], wsk_ref[...],
                       preferred_element_type=jnp.float32) + bs_ref[...]

        # ---- residual add + final relu (lane-dense store) ----
        o_ref[0] = jnp.maximum(out + skip, 0.0).astype(o_ref.dtype)

    return kernel


def residual_block_1d_nlc(x_nlc, params, *, compute_dtype=jnp.bfloat16,
                          out_dtype=None, max_tile=512):
    """Channels-last entry point: x (N, L, C_in) -> (N, L, C_out)."""
    N, L, C_in = x_nlc.shape
    C_out = params['conv1_w'].shape[0]
    cdt = jnp.dtype(compute_dtype)
    odt = jnp.dtype(out_dtype) if out_dtype is not None else cdt

    TL = _choose_tile(L, max_tile)
    L_pad = _round_up(L, TL)
    T = L_pad // TL
    Cin_p = _round_up(C_in, LANE)
    Cout_p = _round_up(C_out, LANE)

    # Single pad: 2 halo rows each side (+ tail up to L_pad) and zero channel
    # padding to a lane-dense multiple of 128.  Stays the only HBM copy.
    x_pad = jnp.pad(x_nlc.astype(cdt),
                    ((0, 0), (2, L_pad - L + 2), (0, Cin_p - C_in)))

    # Fold BN scale into conv weights; keep only the shift as a bias.
    s1, b1 = _fold_bn(*params['bn1'])
    s2, b2 = _fold_bn(*params['bn2'])
    ss, bs = _fold_bn(*params['bn_skip'])

    w1 = jnp.transpose(params['conv1_w'], (2, 1, 0)) * s1    # (K, Cin, Cout)
    w2 = jnp.transpose(params['conv2_w'], (2, 1, 0)) * s2    # (K, Cout, Cout)
    wsk = params['skip_w'][:, :, 0].T * ss                   # (Cin, Cout)

    w1 = jnp.pad(w1, ((0, 0), (0, Cin_p - C_in), (0, Cout_p - C_out))
                 ).reshape(K * Cin_p, Cout_p).astype(cdt)
    w2 = jnp.pad(w2, ((0, 0), (0, Cout_p - C_out), (0, Cout_p - C_out))
                 ).reshape(K * Cout_p, Cout_p).astype(cdt)
    wsk = jnp.pad(wsk, ((0, Cin_p - C_in), (0, Cout_p - C_out))).astype(cdt)

    b1 = jnp.pad(b1, (0, Cout_p - C_out)).reshape(1, Cout_p)
    b2 = jnp.pad(b2, (0, Cout_p - C_out)).reshape(1, Cout_p)
    bs = jnp.pad(bs, (0, Cout_p - C_out)).reshape(1, Cout_p)

    # VMEM budget: x window (2 slots) + pipelined output (2 bufs) + constants
    # (x2: double-buffered by default) + in-kernel temporaries; 1.5x headroom,
    # capped at 64 MiB (v7x physical).  Lower max_tile if the cap is hit.
    csz, osz = cdt.itemsize, odt.itemsize
    est = (2 * (TL + 4) * Cin_p * csz
           + 2 * TL * Cout_p * osz
           + 2 * (K * Cin_p * Cout_p + K * Cout_p * Cout_p
                  + Cin_p * Cout_p) * csz
           + 6 * Cout_p * 4
           + (TL + 2) * (3 * Cin_p + Cout_p) * 4
           + (TL + 2) * Cout_p * csz + TL * 3 * Cout_p * csz
           + 3 * TL * Cout_p * 4)
    vmem_limit = min(max(int(1.5 * est), 16 * 1024 * 1024), 64 * 1024 * 1024)

    vec_spec = pl.BlockSpec((1, Cout_p), lambda n, t: (0, 0))
    grid_spec = pltpu.PrefetchScalarGridSpec(
        num_scalar_prefetch=0,
        grid=(N, T),
        in_specs=[
            pl.BlockSpec(memory_space=pl.ANY),                       # x in HBM
            pl.BlockSpec((K * Cin_p, Cout_p), lambda n, t: (0, 0)),  # w1
            vec_spec,                                                # b1
            pl.BlockSpec((K * Cout_p, Cout_p), lambda n, t: (0, 0)), # w2
            vec_spec,                                                # b2
            pl.BlockSpec((Cin_p, Cout_p), lambda n, t: (0, 0)),      # wsk
            vec_spec,                                                # bs
        ],
        out_specs=pl.BlockSpec((1, TL, Cout_p), lambda n, t: (n, t, 0)),
        scratch_shapes=[
            pltpu.VMEM((2, TL + 4, Cin_p), cdt),      # double-buffered window
            pltpu.SemaphoreType.DMA((2,)),
        ],
    )

    out = pl.pallas_call(
        _make_kernel(TL, L),
        out_shape=jax.ShapeDtypeStruct((N, L_pad, Cout_p), odt),
        grid_spec=grid_spec,
        compiler_params=pltpu.CompilerParams(
            dimension_semantics=("parallel", "arbitrary"),
            vmem_limit_bytes=vmem_limit,
        ),
    )(x_pad, w1, b1, w2, b2, wsk, bs)

    return out[:, :L, :C_out]


def residual_block_1d(x_ncl, params, *, compute_dtype=jnp.bfloat16,
                      out_dtype=None, max_tile=512):
    """PyTorch-layout wrapper: x (N, C_in, L) -> (N, C_out, L)."""
    x_nlc = jnp.transpose(x_ncl, (0, 2, 1))
    out = residual_block_1d_nlc(x_nlc, params, compute_dtype=compute_dtype,
                                out_dtype=out_dtype, max_tile=max_tile)
    return jnp.transpose(out, (0, 2, 1))


# ----------------------- pure-JAX reference (NCL) -----------------------
def reference_forward(x_ncl, params):
    hp = jax.lax.Precision.HIGHEST

    def conv1d_k3(x, w):  # x (N,C,L), w (Co,Ci,3), stride 1, pad 1
        xp_ = jnp.pad(x, ((0, 0), (0, 0), (1, 1)))
        L = x.shape[2]
        out = 0.0
        for k in range(K):
            out = out + jnp.einsum('ncl,oc->nol', xp_[:, :, k:k + L],
                                   w[:, :, k], precision=hp)
        return out

    def conv1x1(x, w):
        return jnp.einsum('ncl,oc->nol', x, w[:, :, 0], precision=hp)

    def bn(x, p):
        g, b, m, v = p
        return (x - m[None, :, None]) / jnp.sqrt(v[None, :, None] + EPS) \
            * g[None, :, None] + b[None, :, None]

    out = jax.nn.relu(bn(conv1d_k3(x_ncl, params['conv1_w']), params['bn1']))
    out = bn(conv1d_k3(out, params['conv2_w']), params['bn2'])
    out = out + bn(conv1x1(x_ncl, params['skip_w']), params['bn_skip'])
    return jax.nn.relu(out)


if __name__ == "__main__":
    key = jax.random.PRNGKey(0)
    ks = jax.random.split(key, 16)

    C_in, C_out = 4, 8

    def bn_params(k0, k1, k2, k3, c):
        gamma = 1.0 + 0.1 * jax.random.normal(k0, (c,), jnp.float32)
        beta = 0.1 * jax.random.normal(k1, (c,), jnp.float32)
        mean = 0.1 * jax.random.normal(k2, (c,), jnp.float32)
        var = jax.random.uniform(k3, (c,), jnp.float32, minval=0.5, maxval=1.5)
        return (gamma, beta, mean, var)

    params = {
        'conv1_w': 0.3 * jax.random.normal(ks[0], (C_out, C_in, K), jnp.float32),
        'conv2_w': 0.3 * jax.random.normal(ks[1], (C_out, C_out, K), jnp.float32),
        'skip_w': 0.3 * jax.random.normal(ks[2], (C_out, C_in, 1), jnp.float32),
        'bn1': bn_params(ks[3], ks[4], ks[5], ks[6], C_out),
        'bn2': bn_params(ks[7], ks[8], ks[9], ks[10], C_out),
        'bn_skip': bn_params(ks[11], ks[12], ks[13], ks[14], C_out),
    }

    # --- test 1: single length-tile, f32 compute, tight check ---
    N, L = 2, 16
    x = jax.random.normal(ks[15], (N, C_in, L), jnp.float32)
    out = jax.block_until_ready(
        residual_block_1d(x, params, compute_dtype=jnp.float32,
                          out_dtype=jnp.float32))
    ref = reference_forward(x, params)
    assert out.shape == (N, C_out, L)
    assert jnp.allclose(out, ref, atol=2e-3, rtol=2e-3), \
        f"max abs err {jnp.max(jnp.abs(out - ref))}"

    # --- test 2: multi-tile (TL=16, T=3) with cross-tile halos + padded tail ---
    L2 = 40                                  # not a multiple of the 16-row tile
    x2 = jax.random.normal(jax.random.PRNGKey(1), (N, C_in, L2), jnp.float32)
    out2 = jax.block_until_ready(
        residual_block_1d(x2, params, compute_dtype=jnp.float32,
                          out_dtype=jnp.float32, max_tile=16))
    ref2 = reference_forward(x2, params)
    assert out2.shape == (N, C_out, L2)
    assert jnp.allclose(out2, ref2, atol=2e-3, rtol=2e-3), \
        f"max abs err {jnp.max(jnp.abs(out2 - ref2))}"

    # --- test 3: default bf16 compute path (smoke) ---
    out_bf = jax.block_until_ready(residual_block_1d(x, params))
    assert out_bf.shape == (N, C_out, L)
    assert bool(jnp.all(jnp.isfinite(out_bf.astype(jnp.float32))))

    print("KERNEL_OK")
</pallas_src>

<mosaic_0001>
module attributes {stable_mosaic.version = 11 : i64} {
  func.func @kernel(%arg0: i32, %arg1: i32, %arg2: memref<2x20x128xf32, #tpu.memory_space<any>>, %arg3: memref<384x128xf32, #tpu.memory_space<vmem>>, %arg4: memref<1x128xf32, #tpu.memory_space<vmem>>, %arg5: memref<384x128xf32, #tpu.memory_space<vmem>>, %arg6: memref<1x128xf32, #tpu.memory_space<vmem>>, %arg7: memref<128x128xf32, #tpu.memory_space<vmem>>, %arg8: memref<1x128xf32, #tpu.memory_space<vmem>>, %arg9: memref<1x16x128xf32, #tpu.memory_space<vmem>>, %arg10: memref<2x20x128xf32, #tpu.memory_space<vmem>>, %arg11: memref<2x!tpu.dma_semaphore, #tpu.memory_space<semaphore_mem>>) attributes {dimension_semantics = [#tpu.dimension_semantics<parallel>, #tpu.dimension_semantics<arbitrary>], iteration_bounds = array<i64: 2, 1>, scalar_prefetch = 0 : i64, scratch_operands = 2 : i64, tpu.core_type = #tpu.core_type<tc>, window_params = [{}, {pipeline_mode = #tpu.pipeline_mode<synchronous>, transform_indices = @transform_1, window_bounds = array<i64: 384, 128>}, {pipeline_mode = #tpu.pipeline_mode<synchronous>, transform_indices = @transform_2, window_bounds = array<i64: 1, 128>}, {pipeline_mode = #tpu.pipeline_mode<synchronous>, transform_indices = @transform_3, window_bounds = array<i64: 384, 128>}, {pipeline_mode = #tpu.pipeline_mode<synchronous>, transform_indices = @transform_4, window_bounds = array<i64: 1, 128>}, {pipeline_mode = #tpu.pipeline_mode<synchronous>, transform_indices = @transform_5, window_bounds = array<i64: 128, 128>}, {pipeline_mode = #tpu.pipeline_mode<synchronous>, transform_indices = @transform_6, window_bounds = array<i64: 1, 128>}, {transform_indices = @transform_7, window_bounds = array<i64: 1, 16, 128>}]} {
    %c2_i32 = arith.constant 2 : i32
    %c0_i32 = arith.constant 0 : i32
    %0 = arith.cmpi eq, %c2_i32, %c0_i32 : i32
    %c1_i32 = arith.constant 1 : i32
    %1 = arith.select %0, %c1_i32, %c2_i32 : i32
    %2 = arith.remsi %arg1, %1 : i32
    %c0_i32_0 = arith.constant 0 : i32
    %3 = arith.cmpi ne, %2, %c0_i32_0 : i32
    %c0_i32_1 = arith.constant 0 : i32
    %4 = arith.cmpi slt, %2, %c0_i32_1 : i32
    %c0_i32_2 = arith.constant 0 : i32
    %5 = arith.cmpi slt, %1, %c0_i32_2 : i32
    %6 = arith.xori %4, %5 : i1
    %7 = arith.andi %6, %3 : i1
    %8 = arith.addi %2, %1 : i32
    %9 = arith.select %7, %8, %2 : i32
    %c0_i32_3 = arith.constant 0 : i32
    %10 = arith.cmpi eq, %arg1, %c0_i32_3 : i32
    %11 = arith.extui %10 : i1 to i32
    %c0_i32_4 = arith.constant 0 : i32
    %12 = arith.cmpi ne, %11, %c0_i32_4 : i32
    scf.if %12 {
      %c0_i32_36 = arith.constant 0 : i32
      %c0_i32_37 = arith.constant 0 : i32
      %c0_i32_38 = arith.constant 0 : i32
      %c0_i32_39 = arith.constant 0 : i32
      %73 = tpu.memref_slice %arg2[%arg0, %c0_i32_38, %c0_i32_39] : memref<2x20x128xf32, #tpu.memory_space<any>> -> memref<1x20x128xf32, #tpu.memory_space<any>>
      %74 = tpu.memref_squeeze %73 : memref<1x20x128xf32, #tpu.memory_space<any>> -> memref<20x128xf32, #tpu.memory_space<any>>
      %c0_i32_40 = arith.constant 0 : i32
      %c0_i32_41 = arith.constant 0 : i32
      %75 = tpu.memref_slice %arg10[%c0_i32_36, %c0_i32_40, %c0_i32_41] : memref<2x20x128xf32, #tpu.memory_space<vmem>> -> memref<1x20x128xf32, #tpu.memory_space<vmem>>
      %76 = tpu.memref_squeeze %75 : memref<1x20x128xf32, #tpu.memory_space<vmem>> -> memref<20x128xf32, #tpu.memory_space<vmem>>
      %77 = tpu.memref_slice %arg11[%c0_i32_37] : memref<2x!tpu.dma_semaphore, #tpu.memory_space<semaphore_mem>> -> memref<1x!tpu.dma_semaphore, #tpu.memory_space<semaphore_mem>>
      %78 = tpu.memref_squeeze %77 : memref<1x!tpu.dma_semaphore, #tpu.memory_space<semaphore_mem>> -> memref<!tpu.dma_semaphore, #tpu.memory_space<semaphore_mem>>
      tpu.enqueue_dma source(%74 : memref<20x128xf32, #tpu.memory_space<any>>) target(%76 : memref<20x128xf32, #tpu.memory_space<vmem>>) target_semaphore(%78 : memref<!tpu.dma_semaphore, #tpu.memory_space<semaphore_mem>>)
    } else {
    }
    %c1_i32_5 = arith.constant 1 : i32
    %13 = arith.addi %arg1, %c1_i32_5 : i32
    %c1_i32_6 = arith.constant 1 : i32
    %14 = arith.cmpi slt, %13, %c1_i32_6 : i32
    %15 = arith.extui %14 : i1 to i32
    %c0_i32_7 = arith.constant 0 : i32
    %16 = arith.cmpi ne, %15, %c0_i32_7 : i32
    scf.if %16 {
      %c1_i32_36 = arith.constant 1 : i32
      %73 = arith.addi %arg1, %c1_i32_36 : i32
      %c1_i32_37 = arith.constant 1 : i32
      %74 = arith.subi %c1_i32_37, %9 : i32
      %c16_i32_38 = arith.constant 16 : i32
      %75 = arith.muli %73, %c16_i32_38 : i32
      %c0_i32_39 = arith.constant 0 : i32
      %76 = tpu.memref_slice %arg2[%arg0, %75, %c0_i32_39] : memref<2x20x128xf32, #tpu.memory_space<any>> -> memref<1x20x128xf32, #tpu.memory_space<any>>
      %77 = tpu.memref_squeeze %76 : memref<1x20x128xf32, #tpu.memory_space<any>> -> memref<20x128xf32, #tpu.memory_space<any>>
      %c0_i32_40 = arith.constant 0 : i32
      %c0_i32_41 = arith.constant 0 : i32
      %78 = tpu.memref_slice %arg10[%74, %c0_i32_40, %c0_i32_41] : memref<2x20x128xf32, #tpu.memory_space<vmem>> -> memref<1x20x128xf32, #tpu.memory_space<vmem>>
      %79 = tpu.memref_squeeze %78 : memref<1x20x128xf32, #tpu.memory_space<vmem>> -> memref<20x128xf32, #tpu.memory_space<vmem>>
      %80 = tpu.memref_slice %arg11[%74] : memref<2x!tpu.dma_semaphore, #tpu.memory_space<semaphore_mem>> -> memref<1x!tpu.dma_semaphore, #tpu.memory_space<semaphore_mem>>
      %81 = tpu.memref_squeeze %80 : memref<1x!tpu.dma_semaphore, #tpu.memory_space<semaphore_mem>> -> memref<!tpu.dma_semaphore, #tpu.memory_space<semaphore_mem>>
      tpu.enqueue_dma source(%77 : memref<20x128xf32, #tpu.memory_space<any>>) target(%79 : memref<20x128xf32, #tpu.memory_space<vmem>>) target_semaphore(%81 : memref<!tpu.dma_semaphore, #tpu.memory_space<semaphore_mem>>)
    } else {
    }
    %c16_i32 = arith.constant 16 : i32
    %17 = arith.muli %arg1, %c16_i32 : i32
    %c0_i32_8 = arith.constant 0 : i32
    %18 = tpu.memref_slice %arg2[%arg0, %17, %c0_i32_8] : memref<2x20x128xf32, #tpu.memory_space<any>> -> memref<1x20x128xf32, #tpu.memory_space<any>>
    %19 = tpu.memref_squeeze %18 : memref<1x20x128xf32, #tpu.memory_space<any>> -> memref<20x128xf32, #tpu.memory_space<any>>
    %c0_i32_9 = arith.constant 0 : i32
    %c0_i32_10 = arith.constant 0 : i32
    %20 = tpu.memref_slice %arg10[%9, %c0_i32_9, %c0_i32_10] : memref<2x20x128xf32, #tpu.memory_space<vmem>> -> memref<1x20x128xf32, #tpu.memory_space<vmem>>
    %21 = tpu.memref_squeeze %20 : memref<1x20x128xf32, #tpu.memory_space<vmem>> -> memref<20x128xf32, #tpu.memory_space<vmem>>
    %22 = tpu.memref_slice %arg11[%9] : memref<2x!tpu.dma_semaphore, #tpu.memory_space<semaphore_mem>> -> memref<1x!tpu.dma_semaphore, #tpu.memory_space<semaphore_mem>>
    %23 = tpu.memref_squeeze %22 : memref<1x!tpu.dma_semaphore, #tpu.memory_space<semaphore_mem>> -> memref<!tpu.dma_semaphore, #tpu.memory_space<semaphore_mem>>
    tpu.wait_dma2 semaphore(%23 : memref<!tpu.dma_semaphore, #tpu.memory_space<semaphore_mem>>) src(%19 : memref<20x128xf32, #tpu.memory_space<any>>) dst(%21 : memref<20x128xf32, #tpu.memory_space<vmem>>)
    %24 = arith.index_cast %9 : i32 to index
    %c0 = arith.constant 0 : index
    %c0_11 = arith.constant 0 : index
    %25 = vector.load %arg10[%24, %c0, %c0_11] : memref<2x20x128xf32, #tpu.memory_space<vmem>>, vector<1x20x128xf32>
    %26 = vector.shape_cast %25 : vector<1x20x128xf32> to vector<20x128xf32>
    %27 = vector.extract_strided_slice %26 {offsets = [0, 0], sizes = [18, 128], strides = [1, 1]} : vector<20x128xf32> to vector<18x128xf32>
    %28 = vector.extract_strided_slice %26 {offsets = [1, 0], sizes = [18, 128], strides = [1, 1]} : vector<20x128xf32> to vector<18x128xf32>
    %29 = vector.extract_strided_slice %26 {offsets = [2, 0], sizes = [18, 128], strides = [1, 1]} : vector<20x128xf32> to vector<18x128xf32>
    %30 = tpu.concatenate %27, %28, %29 in 1 : vector<18x128xf32>, vector<18x128xf32>, vector<18x128xf32> -> vector<18x384xf32>
    %c0_12 = arith.constant 0 : index
    %c0_13 = arith.constant 0 : index
    %31 = vector.load %arg3[%c0_12, %c0_13] : memref<384x128xf32, #tpu.memory_space<vmem>>, vector<384x128xf32>
    %cst = arith.constant dense<0.000000e+00> : vector<18x128xf32>
    %32 = tpu.matmul %30, %31, %cst {dimension_numbers = #tpu.dot_dimension_numbers<[1], [0], [0], [1], [0, 0, 1, 1], [], []>} : vector<18x384xf32>, vector<384x128xf32>, vector<18x128xf32> -> vector<18x128xf32>
    %c0_14 = arith.constant 0 : index
    %c0_15 = arith.constant 0 : index
    %33 = vector.load %arg4[%c0_14, %c0_15] : memref<1x128xf32, #tpu.memory_space<vmem>>, vector<1x128xf32>
    %34 = vector.broadcast %33 : vector<1x128xf32> to vector<18x128xf32>
    %35 = arith.addf %32, %34 : vector<18x128xf32>
    %cst_16 = arith.constant 0.000000e+00 : f32
    %36 = vector.broadcast %cst_16 : f32 to vector<18x128xf32>
    %37 = arith.maximumf %35, %36 : vector<18x128xf32>
    %38 = tpu.iota {dimensions = array<i32: 0>} : vector<18x1xi32>
    %c16_i32_17 = arith.constant 16 : i32
    %39 = arith.muli %arg1, %c16_i32_17 : i32
    %c1_i32_18 = arith.constant 1 : i32
    %40 = arith.subi %39, %c1_i32_18 : i32
    %41 = vector.broadcast %40 : i32 to vector<18x1xi32>
    %42 = arith.addi %41, %38 : vector<18x1xi32>
    %c0_i32_19 = arith.constant 0 : i32
    %43 = vector.broadcast %c0_i32_19 : i32 to vector<18x1xi32>
    %44 = arith.cmpi slt, %42, %43 : vector<18x1xi32>
    %c16_i32_20 = arith.constant 16 : i32
    %45 = vector.broadcast %c16_i32_20 : i32 to vector<18x1xi32>
    %46 = arith.cmpi sge, %42, %45 : vector<18x1xi32>
    %47 = arith.ori %44, %46 : vector<18x1xi1>
    %cst_21 = arith.constant 0.000000e+00 : f32
    %48 = vector.shape_cast %47 : vector<18x1xi1> to vector<18x1xi1>
    %49 = vector.broadcast %48 : vector<18x1xi1> to vector<18x128xi1>
    %50 = vector.broadcast %cst_21 : f32 to vector<18x128xf32>
    %51 = arith.select %49, %50, %37 : vector<18x128xi1>, vector<18x128xf32>
    %52 = vector.extract_strided_slice %51 {offsets = [0, 0], sizes = [16, 128], strides = [1, 1]} : vector<18x128xf32> to vector<16x128xf32>
    %53 = vector.extract_strided_slice %51 {offsets = [1, 0], sizes = [16, 128], strides = [1, 1]} : vector<18x128xf32> to vector<16x128xf32>
    %54 = vector.extract_strided_slice %51 {offsets = [2, 0], sizes = [16, 128], strides = [1, 1]} : vector<18x128xf32> to vector<16x128xf32>
    %55 = tpu.concatenate %52, %53, %54 in 1 : vector<16x128xf32>, vector<16x128xf32>, vector<16x128xf32> -> vector<16x384xf32>
    %c0_22 = arith.constant 0 : index
    %c0_23 = arith.constant 0 : index
    %56 = vector.load %arg5[%c0_22, %c0_23] : memref<384x128xf32, #tpu.memory_space<vmem>>, vector<384x128xf32>
    %cst_24 = arith.constant dense<0.000000e+00> : vector<16x128xf32>
    %57 = tpu.matmul %55, %56, %cst_24 {dimension_numbers = #tpu.dot_dimension_numbers<[1], [0], [0], [1], [0, 0, 1, 1], [], []>} : vector<16x384xf32>, vector<384x128xf32>, vector<16x128xf32> -> vector<16x128xf32>
    %c0_25 = arith.constant 0 : index
    %c0_26 = arith.constant 0 : index
    %58 = vector.load %arg6[%c0_25, %c0_26] : memref<1x128xf32, #tpu.memory_space<vmem>>, vector<1x128xf32>
    %59 = vector.broadcast %58 : vector<1x128xf32> to vector<16x128xf32>
    %60 = arith.addf %57, %59 : vector<16x128xf32>
    %61 = vector.extract_strided_slice %26 {offsets = [2, 0], sizes = [16, 128], strides = [1, 1]} : vector<20x128xf32> to vector<16x128xf32>
    %c0_27 = arith.constant 0 : index
    %c0_28 = arith.constant 0 : index
    %62 = vector.load %arg7[%c0_27, %c0_28] : memref<128x128xf32, #tpu.memory_space<vmem>>, vector<128x128xf32>
    %cst_29 = arith.constant dense<0.000000e+00> : vector<16x128xf32>
    %63 = tpu.matmul %61, %62, %cst_29 {dimension_numbers = #tpu.dot_dimension_numbers<[1], [0], [0], [1], [0, 0, 1, 1], [], []>} : vector<16x128xf32>, vector<128x128xf32>, vector<16x128xf32> -> vector<16x128xf32>
    %c0_30 = arith.constant 0 : index
    %c0_31 = arith.constant 0 : index
    %64 = vector.load %arg8[%c0_30, %c0_31] : memref<1x128xf32, #tpu.memory_space<vmem>>, vector<1x128xf32>
    %65 = vector.broadcast %64 : vector<1x128xf32> to vector<16x128xf32>
    %66 = arith.addf %63, %65 : vector<16x128xf32>
    %67 = arith.addf %60, %66 : vector<16x128xf32>
    %cst_32 = arith.constant 0.000000e+00 : f32
    %68 = vector.broadcast %cst_32 : f32 to vector<16x128xf32>
    %69 = arith.maximumf %67, %68 : vector<16x128xf32>
    %c0_33 = arith.constant 0 : index
    %c0_34 = arith.constant 0 : index
    %c0_35 = arith.constant 0 : index
    %70 = vector.load %arg9[%c0_33, %c0_34, %c0_35] : memref<1x16x128xf32, #tpu.memory_space<vmem>>, vector<1x16x128xf32>
    %71 = vector.shape_cast %70 : vector<1x16x128xf32> to vector<16x128xf32>
    %72 = vector.shape_cast %69 : vector<16x128xf32> to vector<1x16x128xf32>
    tpu.vector_store %arg9[%c0_33, %c0_34, %c0_35], %72 {strides = array<i32>} : memref<1x16x128xf32, #tpu.memory_space<vmem>>, vector<1x16x128xf32>,
    return
  }
  func.func @transform_1(%arg0: i32, %arg1: i32) -> (i32, i32) {
    %c0_i32 = arith.constant 0 : i32
    %c0_i32_0 = arith.constant 0 : i32
    %c0_i32_1 = arith.constant 0 : i32
    return %c0_i32, %c0_i32_0 : i32, i32
  }
  func.func @transform_2(%arg0: i32, %arg1: i32) -> (i32, i32) {
    %c0_i32 = arith.constant 0 : i32
    %c0_i32_0 = arith.constant 0 : i32
    %c0_i32_1 = arith.constant 0 : i32
    return %c0_i32, %c0_i32_0 : i32, i32
  }
  func.func @transform_3(%arg0: i32, %arg1: i32) -> (i32, i32) {
    %c0_i32 = arith.constant 0 : i32
    %c0_i32_0 = arith.constant 0 : i32
    %c0_i32_1 = arith.constant 0 : i32
    return %c0_i32, %c0_i32_0 : i32, i32
  }
  func.func @transform_4(%arg0: i32, %arg1: i32) -> (i32, i32) {
    %c0_i32 = arith.constant 0 : i32
    %c0_i32_0 = arith.constant 0 : i32
    %c0_i32_1 = arith.constant 0 : i32
    return %c0_i32, %c0_i32_0 : i32, i32
  }
  func.func @transform_5(%arg0: i32, %arg1: i32) -> (i32, i32) {
    %c0_i32 = arith.constant 0 : i32
    %c0_i32_0 = arith.constant 0 : i32
    %c0_i32_1 = arith.constant 0 : i32
    return %c0_i32, %c0_i32_0 : i32, i32
  }
  func.func @transform_6(%arg0: i32, %arg1: i32) -> (i32, i32) {
    %c0_i32 = arith.constant 0 : i32
    %c0_i32_0 = arith.constant 0 : i32
    %c0_i32_1 = arith.constant 0 : i32
    return %c0_i32, %c0_i32_0 : i32, i32
  }
  func.func @transform_7(%arg0: i32, %arg1: i32) -> (i32, i32, i32) {
    %c0_i32 = arith.constant 0 : i32
    %c0_i32_0 = arith.constant 0 : i32
    return %arg0, %arg1, %c0_i32 : i32, i32, i32
  }
}

</mosaic_0001>

<bundles_post_ra>
// kernel: tpu_custom_call.1
= control target key start
LH: loop header
LB: loop body
LE: loop exit
PB: predicated region body
PF: predicated region fallthrough
CT: control target
= control target key end

     0   :  { %s2232_s0 = inlined_call_operand.vmem [shape: f32[2,20,128], index: 0, kind: input, shape index: {}]   ;;  %s2233_s1 = inlined_call_operand.hbm [shape: f32[384,128], index: 1, kind: input, shape index: {}]   ;;  %s2234_s2 = inlined_call_operand.vmem [shape: f32[1,128], index: 2, kind: input, shape index: {}]   ;;  %s2235_s3 = inlined_call_operand.hbm [shape: f32[384,128], index: 3, kind: input, shape index: {}]   ;;  %s2236_s4 = inlined_call_operand.vmem [shape: f32[1,128], index: 4, kind: input, shape index: {}]   ;;  %s2237_s5 = inlined_call_operand.hbm [shape: f32[128,128], index: 5, kind: input, shape index: {}]   ;;  %s2238_s6 = inlined_call_operand.vmem [shape: f32[1,128], index: 6, kind: input, shape index: {}]   ;;  %s2239_s7 = inlined_call_operand.hbm [shape: f32[2,16,128], index: 7, kind: output, shape index: {}]  }
   0x1   :  { %2247 = sst [smem:[#allocation21_spill]] %s2235_s3 }
   0x2   :  { %12 = vsyncpa [#allocation5], 0 }
   0x3   :  { %13 = vsyncpa [#allocation8], 0 }
   0x4   :  { %14 = vsyncpa [#allocation6], 0 }
   0x5   :  { %16 = vsyncpa [#allocation6 + $0x1], 0  ;;  %s1954_s24 = smov 0   ;;  %s1956_s25 = smov 0  }
   0x6   :  { %s1958_s26 = smov 0   ;;  %s1960_s27 = smov 0  }
   0x7   :  { %s1962_s28 = smov 0   ;;  %s1964_s29 = smov 0  }
   0x8 LB: > { %2248 = sst [smem:[#allocation17_spill]] %s1889_s26  ;;  %s1198_s30 = sadd.s32 4294967295, %s1901_s29   ;;  %s1901_s29 = sphi %s1964_s29, %s22_s29   ;;  %s1897_s28 = sphi %s1962_s28, %s2266_s28   ;;  %s1893_s27 = sphi %s1960_s27, %s2265_s27   ;;  %s1889_s26 = sphi %s1958_s26, %s2264_s26   ;;  %s1885_s25 = sphi %s1956_s25, %s2268_s25   ;;  %s1881_s24 = sphi %s1954_s24, %s2267_s24  }
   0x9   : > { %2249 = sst [smem:[#allocation18_spill]] %s1897_s28  ;;  %s1199_s8 = sadd.s32 4294967294, %s1901_s29  }
   0xa   : > { %s34_s9 = sadd.s32 1, %s1897_s28  ;;  %s169_s10 = sadd.s32 1, %s1889_s26 }
   0xb   : > { %p36_p0 = scmp.ge.s32.totalorder %s34_s9, 2  ;;  %p179_p1 = scmp.ne.s32.totalorder %s1889_s26, %s1885_s25 }
   0xc   : > { %p180_p2 = scmp.eq.s32.totalorder %s1198_s30, 1  ;;  %p185_p3 = scmp.ne.s32.totalorder %s1885_s25, %s1881_s24 }
   0xd   : > { %s2270_s9 = smov (%p36_p0, %s34_s9), 0  ;;  %p186_p5 = scmp.eq.s32.totalorder %s1199_s8, 1 }
   0xe   : > { %2250 = sst [smem:[#allocation19_spill]] %s2270_s9  ;;  %p1994_p4 = por %p180_p2, %p179_p1 }
   0xf   : > { %s164_s12 = ssub.s32 %s1897_s28, %s2270_s9  ;;  %p1200_p6 = scmp.ge.s32.totalorder %s1901_s29, 1 }
  0x10   : > { %s2251_s11 = scalar_select %p1994_p4, 1, 0 }
  0x11   : > { %p167_p7 = scmp.eq.s32.totalorder %s164_s12, 0  ;;  %p2001_p8 = por %p186_p5, %p185_p3 }
  0x12   : > { %p193_p9 = scmp.lt.s32.totalorder %s1901_s29, 3  ;;  %p2013_p11 = scmp.eq.s32.totalorder %s1198_s30, 0 }
  0x13   : > { %s2252_s13 = scalar_select %p2001_p8, 1, 0 }
  0x14   : > { %s2007_s14 = scalar_select %p167_p7, %s1889_s26, %s169_s10  }
  0x15   : > { %p2009_p10 = pnand %p1200_p6, %p193_p9  ;;  %s1903_s17 = smov [#allocation7]  }
  0x16   : > { %2253 = sst [smem:[#allocation20_spill]] %s2007_s14  ;;  %s221_s18 = sshll.u32 %s1903_s17, 4  ;;  %s222_s18 = int_to_ptr.vmem [resolvable:$true] %s221_s18 }
  0x17   : > { %s2254_s15 = scalar_select %p2009_p10, 1, 0 }
  0x18   : > { %s2255_s16 = scalar_select %p2013_p11, 1, 0 }
  0x19   : > { %p1650_p12 = pneg %p2009_p10  ;;  %s1904_s20 = smov [#allocation4]  }
  0x1a   : > { %s205_s21 = sshll.u32 %s1904_s20, 4  ;;  %s2257_s3 = sld [smem:[#allocation21_spill]]  ;;  %s206_s21 = int_to_ptr.vmem [resolvable:$true] %s205_s21 }
  0x1b   : > { %p2021_p13 = pnand %p2013_p11, %p1650_p12 }
  0x1d   : > { %p2033_p1 = pneg %p2021_p13 }
  0x20   : > { %s1729_s30 = scalar_lea.hbm %s2257_s3, 6144 }
  0x21   : > { %p1730_p0 = scmp.ne.s32.totalorder %s2257_s3, %s1729_s30  ;;  %p1736_p5 = scmp.lt.u32.totalorder %s1729_s30, %s2257_s3 }
  0x23   : > { %p1732_p2 = pnand %p2033_p1, %p1730_p0 }
  0x25   : > { %p1733_p3 = pneg %p1732_p2 }
  0x27   : > { %p1738_p6 = pnand %p1736_p5, %p1733_p3 }
  0x29   : > { %1741 = shalt.err (!%p1738_p6)
}
  0x2a   : > { %s1742_s20 = scalar_lea.vmem %s222_s18, 6144  ;;  %p1750_p8 = scmp.lt.s32.totalorder %s222_s18, %s222_s18 }
  0x2b   : > { %p1743_p7 = scmp.ne.s32.totalorder %s222_s18, %s1742_s20  ;;  %p1751_p4 = scmp.lt.s32.totalorder %s1742_s20, %s1742_s20 }
  0x2d   : > { %p1745_p9 = pnand %p1743_p7, %p2033_p1  ;;  %p1752_p11 = por %p1751_p4, %p1750_p8 }
  0x2f   : > { %p1746_p12 = pneg %p1745_p9 }
  0x31   : > { %p1753_p10 = pnand %p1752_p11, %p1746_p12 }
  0x33   : > { %1756 = shalt.err (!%p1753_p10)
}
  0x34   : > { %s1905_s22 = smov 128   ;;  %s1906_s23 = smov 8  }
  0x35   : > { %1656 = dma.hbm_to_vmem [thread:$0]  (!%p2021_p13), %s2257_s3, 6144, %s222_s18, [#allocation8], %s1905_s22, %s1905_s22, %s1906_s23  }
  0x36   : > { %s1757_s17 = scalar_lea.hbm %s2233_s1, 6144 }
  0x37   : > { %p1758_p4 = scmp.ne.s32.totalorder %s2233_s1, %s1757_s17  ;;  %p1764_p11 = scmp.lt.u32.totalorder %s1757_s17, %s2233_s1 }
  0x39   : > { %p1760_p8 = pnand %p1758_p4, %p2033_p1 }
  0x3b   : > { %p1761_p10 = pneg %p1760_p8 }
  0x3d   : > { %p1766_p0 = pnand %p1764_p11, %p1761_p10 }
  0x3f   : > { %1769 = shalt.err (!%p1766_p0)
}
  0x40   : > { %s1770_s9 = scalar_lea.vmem %s206_s21, 6144  ;;  %p1778_p6 = scmp.lt.s32.totalorder %s206_s21, %s206_s21 }
  0x41   : > { %p1771_p2 = scmp.ne.s32.totalorder %s206_s21, %s1770_s9  ;;  %p1779_p7 = scmp.lt.s32.totalorder %s1770_s9, %s1770_s9 }
  0x43   : > { %p1773_p3 = pnand %p1771_p2, %p2033_p1  ;;  %p1780_p9 = por %p1779_p7, %p1778_p6 }
  0x45   : > { %p1774_p5 = pneg %p1773_p3 }
  0x47   : > { %p1781_p12 = pnand %p1780_p9, %p1774_p5 }
  0x49   : > { %1784 = shalt.err (!%p1781_p12)
}
  0x4a   : > { %1653 = dma.hbm_to_vmem [thread:$0]  (!%p2021_p13), %s2233_s1, 6144, %s206_s21, [#allocation5], %s1905_s22, %s1905_s22, %s1906_s23  }
  0x4b   : > { %s1907_s14 = smov [#allocation9]   ;;  %s1785_s10 = scalar_lea.hbm %s2237_s5, 2048 }
  0x4c   : > { %s237_s18 = sshll.u32 %s1907_s14, 4  ;;  %p1786_p4 = scmp.ne.s32.totalorder %s2237_s5, %s1785_s10  ;;  %s238_s18 = int_to_ptr.vmem [resolvable:$true] %s237_s18 }
  0x4d   : > { %p1792_p11 = scmp.lt.u32.totalorder %s1785_s10, %s2237_s5 }
  0x4e   : > { %p1788_p8 = pnand %p1786_p4, %p2033_p1 }
  0x50   : > { %p1789_p10 = pneg %p1788_p8 }
  0x52   : > { %p1794_p0 = pnand %p1792_p11, %p1789_p10 }
  0x54   : > { %1797 = shalt.err (!%p1794_p0)
}
  0x55   : > { %s1798_s21 = scalar_lea.vmem %s238_s18, 2048  ;;  %p1806_p6 = scmp.lt.s32.totalorder %s238_s18, %s238_s18 }
  0x56   : > { %p1799_p2 = scmp.ne.s32.totalorder %s238_s18, %s1798_s21  ;;  %p1807_p7 = scmp.lt.s32.totalorder %s1798_s21, %s1798_s21 }
  0x58   : > { %p1801_p3 = pnand %p1799_p2, %p2033_p1  ;;  %p1808_p9 = por %p1807_p7, %p1806_p6 }
  0x5a   : > { %p1802_p5 = pneg %p1801_p3 }
  0x5c   : > { %p1809_p12 = pnand %p1808_p9, %p1802_p5 }
  0x5e   : > { %1812 = shalt.err (!%p1809_p12)
}
  0x5f   : > { %1659 = dma.hbm_to_vmem [thread:$0]  (!%p2021_p13), %s2237_s5, 2048, %s238_s18, [#allocation8], %s1905_s22, %s1905_s22, %s1906_s23  }
  0x60   : > { %p2259_p4 = scmp.ne.s32.totalorder %s2254_s15, 0 }
  0x61   : > { %p2260_p1 = scmp.ne.s32.totalorder (!%p2259_p4), %s2255_s16, 0 }
  0x62   : > { %256 = sbr.rel (%p2259_p4) target bundleno = 651 (0x28b), region = 44 }
  0x69   : > { %1866 = dma.done.wait (%p2260_p1), [#allocation5], 6144  }
  0x6a   : > { %1868 = vsyncadd (%p2260_p1), [#allocation5], 4294961152 }
  0x6b   : > { %1870 = dma.done.wait (%p2260_p1), [#allocation8], 8192  }
  0x6c   : > { %1872 = vsyncadd (%p2260_p1), [#allocation8], 4294959104  ;;  %s286_s19 = sand.u32 1, %s1885_s25   ;;  %s306_s12 = smul.u32 24, %s1893_s27 }
  0x6d   : > { %s1208_s15 = sshll.u32 %s286_s19, 4 }
  0x6e   : > { %s307_s28 = scalar_lea.vmem %s2232_s0, %s306_s12  ;;  %s2111_s14 = scalar_lea.vmem [#allocation10], %s1208_s15 }
  0x6f   : > { %v345_v0 = vld [vmem:[%s307_s28] sm:$0xff]  ;;  %v347_v1 = vld [vmem:[%s307_s28 + $0x8] sm:$0xff]  ;;  %v1209_v2 = vld [vmem:[%s307_s28 + $0x10] sm:$0xf] }
  0x70   : > { %346 = vst [vmem:[#allocation2] sm:$0xff] %v345_v0  ;;  %348 = vst [vmem:[#allocation2 + $0x8] sm:$0xff] %v347_v1 }
  0x71   : > { %359 = vst [vmem:[#allocation2 + $0x10] sm:$0xf] %v1209_v2 }
  0x72   : > { %363 = vsyncadd [#allocation3], 320 }
  0x73   : > { %1873 = dma.done.wait [#allocation3], 320 }
  0x74   : > { %1874 = vsyncadd [#allocation3], 4294966976  ;;  %v1908_v3 = vmov 0.0|0.0   ;;  %vm1909_vm0 = vmmov 0   ;;  %v1910_v4 = vmov 0.0   ;;  %v480_v5 = vld [vmem:[#allocation4 + $0x80] sm:$0xff] }
  0x75   : > { %1510 = vmatprep.subr.bf16.mxu1 %v1908_v3  ;;  %1399 = vmatprep.mubr.msk.f32.mxu1 %vm1909_vm0, %v1910_v4  ;;  %v481_v6 = vld [vmem:[#allocation4 + $0x88] sm:$0xff]  ;;  %v464_v7 = vld [vmem:[#allocation4] sm:$0xff]  ;;  %v482_v10 = vld [vmem:[#allocation4 + $0x90] sm:$0xff]  ;;  %vm446_vm1 = vcmask 1046528   ;;  %vm455_vm2 = vcmask 1045504   ;;  %s1232_s20 = sshll.u32 %s1893_s27, 8 }
  0x76   : > { %v1478_v8 = vpack.c.bf16 %v481_v6, %v480_v5  ;;  %v465_v9 = vld [vmem:[#allocation4 + $0x8] sm:$0xff]  ;;  %v483_v11 = vld [vmem:[#allocation4 + $0x98] sm:$0xff]  ;;  %v466_v14 = vld [vmem:[#allocation4 + $0x10] sm:$0xff]  ;;  %s1051_s9 = sshll.u32 %s2111_s14, 4  ;;  %s2178_s26 = scalar_lea.hbm %s2239_s7, %s1232_s20  ;;  %s2180_s9 = int_to_ptr.vmem [resolvable:$true] %s1051_s9 }
  0x77   : > { %v1480_v12 = vpack.c.bf16 %v465_v9, %v464_v7  ;;  %v1482_v13 = vpack.c.bf16 %v483_v11, %v482_v10  ;;  %v467_v15 = vld [vmem:[#allocation4 + $0x18] sm:$0xff]  ;;  %v496_v16 = vld [vmem:[#allocation4 + $0x100] sm:$0xff]  ;;  %v497_v17 = vld [vmem:[#allocation4 + $0x108] sm:$0xff]  ;;  %s2186_s12 = scalar_lea.sflag [#allocation6], %s286_s19  ;;  %s1813_s27 = scalar_lea.vmem %s2180_s9, 256 }
  0x78   : > { %1479 = vmatprep.subr.bf16.mxu0 %v1478_v8  ;;  %v484_v18 = vld [vmem:[#allocation4 + $0xa0] sm:$0xff]  ;;  %v485_v19 = vld [vmem:[#allocation4 + $0xa8] sm:$0xff]  ;;  %v1484_v20 = vpack.c.bf16 %v467_v15, %v466_v14  ;;  %v1511_v21 = vpack.c.bf16 %v497_v17, %v496_v16  ;;  %v498_v22 = vld [vmem:[#allocation4 + $0x110] sm:$0xff]  ;;  %p1814_p13 = scmp.ne.s32.totalorder %s2180_s9, %s1813_s27  ;;  %p2261_p8 = scmp.ne.s32.totalorder %s2251_s11, 0 }
  0x79   : > { %1481 = vmatpush3.bf16.msra.mxu0 %v1480_v12  ;;  %v1486_v23 = vpack.c.bf16 %v485_v19, %v484_v18  ;;  %v468_v24 = vld [vmem:[#allocation4 + $0x20] sm:$0xff]  ;;  %v469_v25 = vld [vmem:[#allocation4 + $0x28] sm:$0xff]  ;;  %v499_v26 = vld [vmem:[#allocation4 + $0x118] sm:$0xff]  ;;  %s1911_s15 = smov [#allocation10]  }
  0x7a   : > { %1483 = vmatprep.subr.bf16.mxu0 %v1482_v13  ;;  %1512 = vmatpush3.bf16.msra.mxu1 %v1511_v21  ;;  %v1514_v27 = vpack.c.bf16 %v499_v26, %v498_v22  ;;  %v486_v28 = vld [vmem:[#allocation4 + $0xb0] sm:$0xff]  ;;  %v487_v29 = vld [vmem:[#allocation4 + $0xb8] sm:$0xff]  ;;  %v500_v30 = vld [vmem:[#allocation4 + $0x120] sm:$0xff]  ;;  %v1488_v32 = vpack.c.bf16 %v469_v25, %v468_v24  ;;  %p1815_p10 = pnand %p1814_p13, %p2261_p8  ;;  %s1817_s22 = sshll.u32 %s1911_s15, 4  ;;  %s1818_s22 = int_to_ptr.vmem [resolvable:$false] %s1817_s22 }
  0x7b   : > { %1513 = vmatprep.subr.bf16.mxu1 %v1908_v3  ;;  %v501_v31 = vld [vmem:[#allocation4 + $0x128] sm:$0xff]  ;;  %v1490_v33 = vpack.c.bf16 %v487_v29, %v486_v28  ;;  %v470_v34 = vld [vmem:[#allocation4 + $0x30] sm:$0xff]  ;;  %v471_v35 = vld [vmem:[#allocation4 + $0x38] sm:$0xff]  ;;  %s1819_s23 = scalar_lea.vmem %s1818_s22, 512  ;;  %p1820_p0 = scmp.lt.s32.totalorder %s2180_s9, %s1818_s22 }
  0x7c   : > { %v1517_v36 = vpack.c.bf16 %v501_v31, %v500_v30  ;;  %v488_v37 = vld [vmem:[#allocation4 + $0xc0] sm:$0xff]  ;;  %v489_v38 = vld [vmem:[#allocation4 + $0xc8] sm:$0xff]  ;;  %v502_v39 = vld [vmem:[#allocation4 + $0x130] sm:$0xff]  ;;  %v1492_v41 = vpack.c.bf16 %v471_v35, %v470_v34  ;;  %p1816_p11 = pneg %p1815_p10  ;;  %p1821_p2 = scmp.lt.s32.totalorder %s1819_s23, %s1813_s27 }
  0x7d   : > { %1485 = vmatpush3.bf16.msra.mxu0 %v1484_v20  ;;  %v503_v40 = vld [vmem:[#allocation4 + $0x138] sm:$0xff]  ;;  %v1494_v42 = vpack.c.bf16 %v489_v38, %v488_v37  ;;  %v472_v43 = vld [vmem:[#allocation4 + $0x40] sm:$0xff]  ;;  %v473_v44 = vld [vmem:[#allocation4 + $0x48] sm:$0xff] }
  0x7e   : > { %1487 = vmatprep.subr.bf16.mxu0 %v1486_v23  ;;  %1515 = vmatpush3.bf16.msra.mxu1 %v1514_v27  ;;  %v1520_v45 = vpack.c.bf16 %v503_v40, %v502_v39  ;;  %v490_v46 = vld [vmem:[#allocation4 + $0xd0] sm:$0xff]  ;;  %v491_v47 = vld [vmem:[#allocation4 + $0xd8] sm:$0xff]  ;;  %v504_v48 = vld [vmem:[#allocation4 + $0x140] sm:$0xff]  ;;  %v1496_v52 = vpack.c.bf16 %v473_v44, %v472_v43  ;;  %p1822_p3 = por %p1821_p2, %p1820_p0 }
  0x7f   : > { %1516 = vmatprep.subr.bf16.mxu1 %v1908_v3  ;;  %v505_v49 = vld [vmem:[#allocation4 + $0x148] sm:$0xff]  ;;  %v2119_v50 = vld [vmem:[#allocation2] sm:$0xff]  ;;  %v2121_v51 = vld [vmem:[#allocation2 + $0x8] sm:$0xff]  ;;  %v1498_v55 = vpack.c.bf16 %v491_v47, %v490_v46 }
  0x80   : > { %v447_v53 = vrot.slane %v2119_v50, 1  ;;  %v448_v54 = vrot.slane %v2121_v51, 1  ;;  %v474_v56 = vld [vmem:[#allocation4 + $0x50] sm:$0xff]  ;;  %v475_v57 = vld [vmem:[#allocation4 + $0x58] sm:$0xff]  ;;  %v1523_v58 = vpack.c.bf16 %v505_v49, %v504_v48  ;;  %v492_v59 = vld [vmem:[#allocation4 + $0xe0] sm:$0xff]  ;;  %v456_v29 = vrot.slane %v2119_v50, 2  ;;  %p1823_p5 = pnand %p1822_p3, %p1816_p11 }
  0x81   : > { %1489 = vmatpush3.bf16.msra.mxu0 %v1488_v32  ;;  %v493_v60 = vld [vmem:[#allocation4 + $0xe8] sm:$0xff]  ;;  %v506_v62 = vld [vmem:[#allocation4 + $0x150] sm:$0xff]  ;;  %v507_v63 = vld [vmem:[#allocation4 + $0x158] sm:$0xff]  ;;  %v1500_v0 = vpack.c.bf16 %v475_v57, %v474_v56  ;;  %v457_v30 = vrot.slane %v2121_v51, 2 }
  0x82   : > { %1491 = vmatprep.subr.bf16.mxu0 %v1490_v33  ;;  %1518 = vmatpush3.bf16.msra.mxu1 %v1517_v36  ;;  %v449_v61 = vsel %vm446_vm1, %v447_v53, %v448_v54  ;;  %v1502_v1 = vpack.c.bf16 %v493_v60, %v492_v59  ;;  %v476_v2 = vld [vmem:[#allocation4 + $0x60] sm:$0xff]  ;;  %v477_v5 = vld [vmem:[#allocation4 + $0x68] sm:$0xff]  ;;  %v1526_v6 = vpack.c.bf16 %v507_v63, %v506_v62  ;;  %v494_v7 = vld [vmem:[#allocation4 + $0xf0] sm:$0xff] }
  0x83   : > { %1519 = vmatprep.subr.bf16.mxu1 %v1908_v3  ;;  %583 = vmatprep.mubr.f32.mxu0 %v449_v61  ;;  %v495_v8 = vld [vmem:[#allocation4 + $0xf8] sm:$0xff]  ;;  %v508_v9 = vld [vmem:[#allocation4 + $0x160] sm:$0xff]  ;;  %v509_v10 = vld [vmem:[#allocation4 + $0x168] sm:$0xff]  ;;  %v1504_v11 = vpack.c.bf16 %v477_v5, %v476_v2 }
  0x84   : > { %v1506_v12 = vpack.c.bf16 %v495_v8, %v494_v7  ;;  %v478_v13 = vld [vmem:[#allocation4 + $0x70] sm:$0xff]  ;;  %v479_v14 = vld [vmem:[#allocation4 + $0x78] sm:$0xff]  ;;  %v1529_v15 = vpack.c.bf16 %v509_v10, %v508_v9  ;;  %v2130_v16 = vld [vmem:[#allocation2 + $0x10] sm:$0xf] }
  0x85   : > { %1493 = vmatpush3.bf16.msra.mxu0 %v1492_v41  ;;  %v742_v17 = vld [vmem:[#allocation7 + $0x80] sm:$0xff]  ;;  %v743_v18 = vld [vmem:[#allocation7 + $0x88] sm:$0xff]  ;;  %v510_v19 = vld [vmem:[#allocation4 + $0x170] sm:$0xff]  ;;  %v1508_v21 = vpack.c.bf16 %v479_v14, %v478_v13  ;;  %v450_v24 = vrot.slane %v2130_v16, 1  ;;  %v2141_v41 = vsel %vm455_vm2, %v456_v29, %v457_v30 }
  0x86   : > { %1495 = vmatprep.subr.bf16.mxu0 %v1494_v42  ;;  %1521 = vmatpush3.bf16.msra.mxu1 %v1520_v45  ;;  %v511_v20 = vld [vmem:[#allocation4 + $0x178] sm:$0xff]  ;;  %v758_v22 = vld [vmem:[#allocation7 + $0x100] sm:$0xff]  ;;  %v759_v23 = vld [vmem:[#allocation7 + $0x108] sm:$0xff]  ;;  %v1534_v25 = vpack.c.bf16 %v743_v18, %v742_v17 }
  0x87   : > { %1522 = vmatprep.subr.bf16.mxu1 %v1908_v3  ;;  %v726_v26 = vld [vmem:[#allocation7] sm:$0xff]  ;;  %v727_v27 = vld [vmem:[#allocation7 + $0x8] sm:$0xff]  ;;  %v1532_v28 = vpack.c.bf16 %v511_v20, %v510_v19  ;;  %v744_v31 = vld [vmem:[#allocation7 + $0x90] sm:$0xff]  ;;  %v1566_v33 = vpack.c.bf16 %v759_v23, %v758_v22  ;;  %v451_v37 = vsel %vm446_vm1, %v448_v54, %v450_v24 }
  0x88   : > { %v745_v32 = vld [vmem:[#allocation7 + $0x98] sm:$0xff]  ;;  %v1536_v34 = vpack.c.bf16 %v727_v27, %v726_v26  ;;  %v760_v35 = vld [vmem:[#allocation7 + $0x110] sm:$0xff]  ;;  %v746_v42 = vld [vmem:[#allocation7 + $0xa0] sm:$0xff] }
  0x89   : > { %1497 = vmatpush3.bf16.msra.mxu0 %v1496_v52  ;;  %v761_v36 = vld [vmem:[#allocation7 + $0x118] sm:$0xff]  ;;  %v1538_v38 = vpack.c.bf16 %v745_v32, %v744_v31  ;;  %v728_v39 = vld [vmem:[#allocation7 + $0x10] sm:$0xff]  ;;  %v747_v43 = vld [vmem:[#allocation7 + $0xa8] sm:$0xff] }
  0x8a   : > { %1499 = vmatprep.subr.bf16.mxu0 %v1498_v55  ;;  %1524 = vmatpush3.bf16.msra.mxu1 %v1523_v58  ;;  %v729_v40 = vld [vmem:[#allocation7 + $0x18] sm:$0xff]  ;;  %v1570_v44 = vpack.c.bf16 %v761_v36, %v760_v35  ;;  %v762_v46 = vld [vmem:[#allocation7 + $0x120] sm:$0xff]  ;;  %v763_v47 = vld [vmem:[#allocation7 + $0x128] sm:$0xff]  ;;  %v1542_v48 = vpack.c.bf16 %v747_v43, %v746_v42 }
  0x8b   : > { %1525 = vmatprep.subr.bf16.mxu1 %v1908_v3  ;;  %v1540_v45 = vpack.c.bf16 %v729_v40, %v728_v39  ;;  %v730_v49 = vld [vmem:[#allocation7 + $0x20] sm:$0xff]  ;;  %v731_v52 = vld [vmem:[#allocation7 + $0x28] sm:$0xff]  ;;  %v749_v54 = vld [vmem:[#allocation7 + $0xb8] sm:$0xff]  ;;  %v1574_v55 = vpack.c.bf16 %v763_v47, %v762_v46  ;;  %v682_v39 = vlaneseq }
  0x8c   : > { %v1544_v56 = vpack.c.bf16 %v731_v52, %v730_v49  ;;  %v732_v58 = vld [vmem:[#allocation7 + $0x30] sm:$0xff]  ;;  %v733_v59 = vld [vmem:[#allocation7 + $0x38] sm:$0xff]  ;;  %v750_v63 = vld [vmem:[#allocation7 + $0xc0] sm:$0xff] }
  0x8d   : > { %1501 = vmatpush3.bf16.msra.mxu0 %v1500_v0  ;;  %v764_v60 = vld [vmem:[#allocation7 + $0x130] sm:$0xff]  ;;  %v765_v61 = vld [vmem:[#allocation7 + $0x138] sm:$0xff]  ;;  %v751_v0 = vld [vmem:[#allocation7 + $0xc8] sm:$0xff]  ;;  %v683_v40 = vshrl.u32 %v682_v39, 7 }
  0x8e   : > { %1503 = vmatprep.subr.bf16.mxu0 %v1502_v1  ;;  %1527 = vmatpush3.bf16.msra.mxu1 %v1526_v6  ;;  %v1578_v62 = vpack.c.bf16 %v765_v61, %v764_v60  ;;  %v1550_v1 = vpack.c.bf16 %v751_v0, %v750_v63  ;;  %v734_v2 = vld [vmem:[#allocation7 + $0x40] sm:$0xff]  ;;  %v735_v5 = vld [vmem:[#allocation7 + $0x48] sm:$0xff]  ;;  %v752_v9 = vld [vmem:[#allocation7 + $0xd0] sm:$0xff] }
  0x8f   : > { %1528 = vmatprep.subr.bf16.mxu1 %v1908_v3  ;;  %v766_v6 = vld [vmem:[#allocation7 + $0x140] sm:$0xff]  ;;  %v767_v7 = vld [vmem:[#allocation7 + $0x148] sm:$0xff]  ;;  %v753_v10 = vld [vmem:[#allocation7 + $0xd8] sm:$0xff]  ;;  %v688_v46 = vadd.s32 4294967295, %v683_v40 }
  0x90   : > { %v1582_v8 = vpack.c.bf16 %v767_v7, %v766_v6  ;;  %v737_v13 = vld [vmem:[#allocation7 + $0x58] sm:$0xff]  ;;  %v754_v18 = vld [vmem:[#allocation7 + $0xe0] sm:$0xff]  ;;  %v755_v19 = vld [vmem:[#allocation7 + $0xe8] sm:$0xff] }
  0x91   : > { %1505 = vmatpush3.bf16.msra.mxu0 %v1504_v11  ;;  %v1554_v11 = vpack.c.bf16 %v753_v10, %v752_v9  ;;  %v1558_v20 = vpack.c.bf16 %v755_v19, %v754_v18  ;;  %v739_v22 = vld [vmem:[#allocation7 + $0x68] sm:$0xff]  ;;  %v756_v27 = vld [vmem:[#allocation7 + $0xf0] sm:$0xff]  ;;  %v741_v31 = vld [vmem:[#allocation7 + $0x78] sm:$0xff]  ;;  %vm691_vm3 = vcmp.lt.s32.totalorder %v688_v46, 0 }
  0x92   : > { %1507 = vmatprep.subr.bf16.mxu0 %v1506_v12  ;;  %1530 = vmatpush3.bf16.msra.mxu1 %v1529_v15  ;;  %v736_v12 = vld [vmem:[#allocation7 + $0x50] sm:$0xff]  ;;  %v931_v36 = vld [vmem:[#allocation9] sm:$0xff]  ;;  %vm1222_vm4 = vmneg %vm691_vm3 }
  0x93   : > { %1531 = vmatprep.subr.bf16.mxu1 %v1908_v3  ;;  %v459_v3 = vrot.slane %v2130_v16, 2  ;;  %v1556_v14 = vpack.c.bf16 %v737_v13, %v736_v12  ;;  %v768_v15 = vld [vmem:[#allocation7 + $0x150] sm:$0xff] }
  0x94   : > { %v1220_v43 = vld [vmem:[%s2234_s2] ss:$0 sm:$0xff] }
  0x95   : > { %1509 = vmatpush3.bf16.msra.mxu0 %v1508_v21  ;;  %v2149_v53 = vsel %vm455_vm2, %v457_v30, %v459_v3  ;;  %v738_v21 = vld [vmem:[#allocation7 + $0x60] sm:$0xff]  ;;  %v740_v30 = vld [vmem:[#allocation7 + $0x70] sm:$0xff] }
  0x96   : > { %1535 = vmatprep.subr.bf16.mxu0 %v1534_v25  ;;  %1533 = vmatpush3.bf16.msra.mxu1 %v1532_v28  ;;  %v1560_v23 = vpack.c.bf16 %v739_v22, %v738_v21  ;;  %v771_v25 = vld [vmem:[#allocation7 + $0x168] sm:$0xff]  ;;  %v757_v28 = vld [vmem:[#allocation7 + $0xf8] sm:$0xff]  ;;  %v1564_v32 = vpack.c.bf16 %v741_v31, %v740_v30  ;;  %v935_v22 = vld [vmem:[#allocation9 + $0x20] sm:$0xff] }
  0x97   : > { %1567 = vmatprep.subr.bf16.mxu1 %v1566_v33  ;;  %v1562_v29 = vpack.c.bf16 %v757_v28, %v756_v27  ;;  %v939_v28 = vld [vmem:[#allocation9 + $0x40] sm:$0xff]  ;;  %v941_v31 = vld [vmem:[#allocation9 + $0x50] sm:$0xff] }
  0x98   : > { %584 = vmatmul.mubr.f32.vlgmr.msra.gmra.mrb[0].mxu0 %v2119_v50  ;;  %v748_v50 = vld [vmem:[#allocation7 + $0xb0] sm:$0xff] }
  0x99   : > { %588 = vmatprep.mubr.f32.mxu0 %v451_v37  ;;  %1537 = vmatpush3.bf16.msra.mxu0 %v1536_v34  ;;  %v1546_v57 = vpack.c.bf16 %v749_v54, %v748_v50  ;;  %v773_v34 = vld [vmem:[#allocation7 + $0x178] sm:$0xff]  ;;  %v932_v37 = vld [vmem:[#allocation9 + $0x8] sm:$0xff] }
  0x9a   : > { %1400 = vmatmul.mubr.f32.vlgmr.msra.gmra.mrb[0].mxu1 %v2141_v41  ;;  %1539 = vmatprep.subr.bf16.mxu0 %v1538_v38  ;;  %v1598_v38 = vpack.c.bf16 %v932_v37, %v931_v36  ;;  %v945_v36 = vld [vmem:[#allocation9 + $0x70] sm:$0xff]  ;;  %v946_v37 = vld [vmem:[#allocation9 + $0x78] sm:$0xff] }
  0x9b   : > { %1402 = vmatprep.mubr.msk.f32.mxu1 %vm1909_vm0, %v1910_v4  ;;  %1569 = vmatpush3.bf16.msra.mxu1 %v1566_v33  ;;  %v772_v33 = vld [vmem:[#allocation7 + $0x170] sm:$0xff] }
  0x9c   : > { %589 = vmatmul.mubr.f32.gmra.mrb[2].mxu0 %v2121_v51  ;;  %1571 = vmatprep.subr.bf16.mxu1 %v1570_v44  ;;  %v1548_v51 = vpack.c.bf16 %v733_v59, %v732_v58  ;;  %v1594_v35 = vpack.c.bf16 %v773_v34, %v772_v33  ;;  %v943_v34 = vld [vmem:[#allocation9 + $0x60] sm:$0xff] }
  0x9d   : > { %593 = vmatprep.mubr.f32.mxu0 %v450_v24  ;;  %1541 = vmatpush3.bf16.msra.mxu0 %v1540_v45  ;;  %v770_v24 = vld [vmem:[#allocation7 + $0x160] sm:$0xff] }
  0x9e   : > { %1403 = vmatmul.mubr.f32.gmra.mrb[2].mxu1 %v2149_v53  ;;  %1543 = vmatprep.subr.bf16.mxu0 %v1542_v48  ;;  %v1590_v26 = vpack.c.bf16 %v771_v25, %v770_v24  ;;  %v937_v25 = vld [vmem:[#allocation9 + $0x30] sm:$0xff] }
  0x9f   : > { %1405 = vmatprep.mubr.msk.f32.mxu1 %vm1909_vm0, %v1910_v4  ;;  %1573 = vmatpush3.bf16.msra.mxu1 %v1570_v44  ;;  %v1552_v4 = vpack.c.bf16 %v735_v5, %v734_v2 }
  0xa0   : > { %594 = vmatmul.mubr.f32.gmra.mrb[4].mxu0 %v2130_v16  ;;  %1575 = vmatprep.subr.bf16.mxu1 %v1574_v55  ;;  %v769_v16 = vld [vmem:[#allocation7 + $0x158] sm:$0xff] }
  0xa1   : > { %1545 = vmatpush3.bf16.msra.mxu0 %v1544_v56  ;;  %v1586_v17 = vpack.c.bf16 %v769_v16, %v768_v15  ;;  %v934_v15 = vld [vmem:[#allocation9 + $0x18] sm:$0xff] }
  0xa2   : > { %1406 = vmatmul.mubr.f32.gmra.mrb[4].mxu1 %v459_v3  ;;  %1547 = vmatprep.subr.bf16.mxu0 %v1546_v57  ;;  %v685_v57 = vadd.s32 16, %v683_v40 }
  0xa3   : > { %1577 = vmatpush3.bf16.msra.mxu1 %v1574_v55 }
  0xa4   : > { %1579 = vmatprep.subr.bf16.mxu1 %v1578_v62 }
  0xa5   : > { %1549 = vmatpush3.bf16.msra.mxu0 %v1548_v51 }
  0xa6   : > { %1551 = vmatprep.subr.bf16.mxu0 %v1550_v1  ;;  %v690_v1 = vadd.s32 4294967295, %v685_v57 }
  0xa7   : > { %1581 = vmatpush3.bf16.msra.mxu1 %v1578_v62 }
  0xa8   : > { %1583 = vmatprep.subr.bf16.mxu1 %v1582_v8  ;;  %vm696_vm5 = vcmp.ge.s32.totalorder %v690_v1, 16 }
  0xa9   : > { %1553 = vmatpush3.bf16.msra.mxu0 %v1552_v4 }
  0xaa   : > { %1555 = vmatprep.subr.bf16.mxu0 %v1554_v11 }
  0xab   : > { %1585 = vmatpush3.bf16.msra.mxu1 %v1582_v8 }
  0xac   : > { %1587 = vmatprep.subr.bf16.mxu1 %v1586_v17 }
  0xad   : > { %1557 = vmatpush3.bf16.msra.mxu0 %v1556_v14  ;;  %v933_v14 = vld [vmem:[#allocation9 + $0x10] sm:$0xff] }
  0xae   : > { %1559 = vmatprep.subr.bf16.mxu0 %v1558_v20  ;;  %v1602_v19 = vpack.c.bf16 %v934_v15, %v933_v14 }
  0xaf   : > { %1589 = vmatpush3.bf16.msra.mxu1 %v1586_v17 }
  0xb0   : > { %1591 = vmatprep.subr.bf16.mxu1 %v1590_v26 }
  0xb1   : > { %1561 = vmatpush3.bf16.msra.mxu0 %v1560_v23  ;;  %v936_v23 = vld [vmem:[#allocation9 + $0x28] sm:$0xff] }
  0xb2   : > { %1563 = vmatprep.subr.bf16.mxu0 %v1562_v29  ;;  %v1606_v24 = vpack.c.bf16 %v936_v23, %v935_v22  ;;  %v940_v29 = vld [vmem:[#allocation9 + $0x48] sm:$0xff] }
  0xb3   : > { %1593 = vmatpush3.bf16.msra.mxu1 %v1590_v26  ;;  %v938_v26 = vld [vmem:[#allocation9 + $0x38] sm:$0xff]  ;;  %v1614_v30 = vpack.c.bf16 %v940_v29, %v939_v28 }
  0xb4   : > { %1595 = vmatprep.subr.bf16.mxu1 %v1594_v35  ;;  %v1610_v27 = vpack.c.bf16 %v938_v26, %v937_v25 }
  0xb5   : > { %1565 = vmatpush3.bf16.msra.mxu0 %v1564_v32  ;;  %v942_v32 = vld [vmem:[#allocation9 + $0x58] sm:$0xff] }
  0xb6   : > { %v1618_v33 = vpack.c.bf16 %v942_v32, %v941_v31 }
  0xb7   : > { %1597 = vmatpush3.bf16.msra.mxu1 %v1594_v35  ;;  %v944_v35 = vld [vmem:[#allocation9 + $0x68] sm:$0xff] }
  0xb8   : > { %1599 = vmatprep.subr.bf16.mxu1 %v1598_v38 }
 0x16b   : > { %v1265_v3 = vpop.f32.mrb[0].mxu0 }
 0x16c   : > { %v1266_v42 = vpop.f32.mrb[1].mxu0 }
 0x16d   : > { %v1267_v44 = vadd.f32 %v1266_v42, %v1265_v3  ;;  %v665_v45 = vpop.f32.mrb[0].mxu1 }
 0x16e   : > { %v1401_v47 = vpop.f32.mrb[1].mxu1 }
 0x16f   : > { %v1268_v48 = vpop.f32.mrb[2].mxu0  ;;  %v586_v49 = vadd.f32 %v1267_v44, %v1220_v43 }
 0x170   : > { %v1269_v52 = vpop.f32.mrb[3].mxu0 }
 0x171   : > { %v666_v50 = vadd.f32 %v665_v45, %v586_v49  ;;  %v1270_v54 = vadd.f32 %v1269_v52, %v1268_v48  ;;  %v670_v55 = vpop.f32.mrb[2].mxu1  ;;  %v1221_v45 = vld [vmem:[%s2236_s4] ss:$0 sm:$0xff] }
 0x172   : > { %v1404_v56 = vpop.f32.mrb[3].mxu1 }
 0x173   : > { %v679_v58 = vmax.f32 %v666_v50, 0.0  ;;  %v1271_v59 = vpop.f32.mrb[4].mxu0  ;;  %v591_v51 = vadd.f32 %v1270_v54, %v1220_v43 }
 0x174   : > { %v1272_v60 = vpop.f32.mrb[5].mxu0 }
 0x175   : > { %v706_v61 = vsel %vm691_vm3, 0.0, %v679_v58  ;;  %v671_v62 = vadd.f32 %v670_v55, %v591_v51  ;;  %v1273_v63 = vadd.f32 %v1272_v60, %v1271_v59  ;;  %v675_v0 = vpop.f32.mrb[4].mxu1 }
 0x176   : > { %v1407_v2 = vpop.f32.mrb[5].mxu1  ;;  %v712_v6 = vrot.slane %v706_v61, 1  ;;  %v719_v7 = vrot.slane %v706_v61, 2 }
 0x177   : > { %v680_v5 = vmax.f32 %v671_v62, 0.0  ;;  %v596_v4 = vadd.f32 %v1273_v63, %v1220_v43 }
 0x179   : > { %v713_v8 = vrot.slane %v680_v5, 1  ;;  %v720_v9 = vrot.slane %v680_v5, 2  ;;  %v676_v10 = vadd.f32 %v675_v0, %v596_v4 }
 0x17b   : > { %v681_v11 = vmax.f32 %v676_v10, 0.0  ;;  %v714_v12 = vsel %vm446_vm1, %v712_v6, %v713_v8  ;;  %v721_v13 = vsel %vm455_vm2, %v719_v7, %v720_v9 }
 0x17c   : > { %845 = vmatprep.mubr.f32.mxu0 %v714_v12  ;;  %1440 = vmatprep.mubr.f32.mxu1 %v721_v13 }
 0x17d   : > { %v708_v16 = vsel %vm696_vm5, 0.0, %v681_v11  ;;  %1223 = vmatmul.mubr.msk.f32.vlgmr.msra.gmra.mrb[6].mxu0 %vm1222_vm4, %v679_v58 }
 0x17e   : > { %v715_v17 = vrot.slane %v708_v16, 1  ;;  %v722_v18 = vrot.slane %v708_v16, 2 }
 0x180   : > { %v716_v20 = vsel %vm446_vm1, %v713_v8, %v715_v17  ;;  %v723_v21 = vsel %vm455_vm2, %v720_v9, %v722_v18 }
 0x181   : > { %850 = vmatprep.mubr.f32.mxu0 %v716_v20  ;;  %1441 = vmatmul.mubr.f32.vlgmr.msra.gmra.mrb[6].mxu1 %v723_v21 }
 0x182   : > { %1601 = vmatpush3.bf16.msra.mxu1 %v1598_v38  ;;  %851 = vmatmul.mubr.f32.gmra.mrb[8].mxu0 %v680_v5  ;;  %v1626_v38 = vpack.c.bf16 %v946_v37, %v945_v36 }
 0x183   : > { %1603 = vmatprep.subr.bf16.mxu1 %v1602_v19  ;;  %1475 = vmatprep.mubr.f32.mxu1 %v2141_v41  ;;  %v1622_v41 = vpack.c.bf16 %v944_v35, %v943_v34 }
 0x186   : > { %1605 = vmatpush3.bf16.msra.mxu1 %v1602_v19 }
 0x187   : > { %1607 = vmatprep.subr.bf16.mxu1 %v1606_v24 }
 0x18a   : > { %1609 = vmatpush3.bf16.msra.mxu1 %v1606_v24 }
 0x18b   : > { %1611 = vmatprep.subr.bf16.mxu1 %v1610_v27 }
 0x18e   : > { %1613 = vmatpush3.bf16.msra.mxu1 %v1610_v27 }
 0x18f   : > { %1615 = vmatprep.subr.bf16.mxu1 %v1614_v30 }
 0x192   : > { %1617 = vmatpush3.bf16.msra.mxu1 %v1614_v30 }
 0x193   : > { %1619 = vmatprep.subr.bf16.mxu1 %v1618_v33 }
 0x196   : > { %1621 = vmatpush3.bf16.msra.mxu1 %v1618_v33 }
 0x197   : > { %1623 = vmatprep.subr.bf16.mxu1 %v1622_v41 }
 0x19a   : > { %1625 = vmatpush3.bf16.msra.mxu1 %v1622_v41 }
 0x19b   : > { %1627 = vmatprep.subr.bf16.mxu1 %v1626_v38 }
 0x19e   : > { %1629 = vmatpush3.bf16.msra.mxu1 %v1626_v38 }
 0x1a1   : > { %1476 = vmatmul.mubr.f32.vlgmr.msra.gmra.mrb[6].mxu1 %v2149_v53  ;;  %v1224_v53 = vld [vmem:[%s2238_s6] ss:$0 sm:$0xff] }
 0x250   : > { %v1325_v39 = vpop.f32.mrb[6].mxu0 }
 0x251   : > { %v1326_v40 = vpop.f32.mrb[7].mxu0 }
 0x252   : > { %v1327_v3 = vadd.f32 %v1326_v40, %v1325_v39 }
 0x254   : > { %v848_v48 = vadd.f32 %v1327_v3, %v1221_v45 }
 0x255   : > { %v1328_v42 = vpop.f32.mrb[8].mxu0 }
 0x256   : > { %v1329_v43 = vpop.f32.mrb[9].mxu0 }
 0x257   : > { %v1330_v44 = vadd.f32 %v1329_v43, %v1328_v42 }
 0x259   : > { %v853_v46 = vadd.f32 %v1330_v44, %v1221_v45 }
 0x274   : > { %v1477_v47 = vpop.f32.mrb[6].mxu1 }
 0x275   : > { %v1630_v49 = vadd.f32 %v1477_v47, %v853_v46  ;;  %v1020_v52 = vpop.f32.mrb[7].mxu1 }
 0x276   : > { %v1632_v50 = vadd.f32 %v1020_v52, %v848_v48 }
 0x277   : > { %v1631_v54 = vadd.f32 %v1630_v49, %v1224_v53 }
 0x278   : > { %v1633_v55 = vadd.f32 %v1632_v50, %v1224_v53 }
 0x279   : > { %v1032_v56 = vmax.f32 %v1631_v54, 0.0 }
 0x27a   : > { %v1031_v57 = vmax.f32 %v1633_v55, 0.0 }
 0x27b   : > { %1034 = vst [vmem:[%s2111_s14 + $0x8] sm:$0xff] %v1032_v56 }
 0x27c   : > { %1033 = vst [vmem:[%s2111_s14] sm:$0xff] %v1031_v57 }
 0x27d   : > { %1826 = shalt.err (!%p1823_p5)
}
 0x27e   : > { %s1827_s19 = scalar_lea.hbm %s2178_s26, 256  ;;  %s1831_s16 = scalar_lea.hbm %s2239_s7, 512 }
 0x27f   : > { %p1828_p6 = scmp.ne.s32.totalorder %s2178_s26, %s1827_s19  ;;  %p1832_p12 = scmp.lt.u32.totalorder %s2178_s26, %s2239_s7 }
 0x280   : > { %p1833_p4 = scmp.lt.u32.totalorder %s1831_s16, %s1827_s19  ;;  %p1835_p13 = scmp.lt.u32.totalorder %s1827_s19, %s2178_s26 }
 0x281   : > { %p1829_p7 = pnand %p1828_p6, %p2261_p8 }
 0x282   : > { %p1834_p1 = por %p1833_p4, %p1832_p12 }
 0x283   : > { %p1830_p9 = pneg %p1829_p7 }
 0x284   : > { %p1836_p10 = por %p1835_p13, %p1834_p1 }
 0x286   : > { %p1837_p11 = pnand %p1836_p10, %p1830_p9 }
 0x288   : > { %1840 = shalt.err (!%p1837_p11)
}
 0x289   : > { %s1912_s8 = smov 128   ;;  %s1913_s10 = smov 8  }
 0x28a   : > { %1648 = dma.vmem_to_hbm [thread:$0]  (%p2261_p8), %s2180_s9, 256, %s2178_s26, %s2186_s12, %s1912_s8, %s1912_s8, %s1913_s10  }
 0x28b PF: > { %p1670_p0 = scmp.ge.s32.totalorder %s1901_s29, 2  ;;  %s1066_s17 = sand.u32 1, %s1881_s24  }
 0x28c   : > { %p2262_p2 = scmp.ne.s32.totalorder %s2252_s13, 0  ;;  %s1067_s20 = scalar_lea.sflag [#allocation6], %s1066_s17 }
 0x28e   : > { %p1661_p3 = pnand %p1670_p0, %p2262_p2 }
 0x290   : > { %1876 = dma.done.wait (!%p1661_p3), %s1067_s20, 256  }
 0x291   : > { %1878 = vsyncadd (!%p1661_p3), %s1067_s20, 4294967040  ;;  %s22_s29 = sadd.s32 1, %s1901_s29   ;;  %s2263_s21 = sld [smem:[#allocation17_spill]] }
 0x292   : > { %p19_p5 = scmp.ge.s32.totalorder %s22_s29, 4   ;;  %s2264_s26 = sld [smem:[#allocation20_spill]] }
 0x293   : > { %s2265_s27 = sld [smem:[#allocation18_spill]]  ;;  %s2266_s28 = sld [smem:[#allocation19_spill]] }
 0x294   : > { %s2267_s24 = smov %s1885_s25  ;;  %21 = sbr.rel (!%p19_p5) target bundleno = 8 (0x8), region = 206 }
 0x297   : > { %s2268_s25 = smov %s2263_s21 }
 0x29b   :  { %1072 = vsyncpa [#allocation5], 1 }
 0x29c   :  { %1074 = vsyncpa [#allocation5 + $0x1], 1 }
 0x29d   :  { %1075 = vsyncpa [#allocation8], 1 }
 0x29e   :  { %1076 = vsyncpa [#allocation6], 1 }
 0x29f   :  { %1078 = vsyncpa [#allocation6 + $0x1], 1 }
 0x2a0   :  { %1079 = vsyncmov [#allocation3] }
 0x2a3   :  { %s1080_s11 = vpop.sfrf %1079 }
 0x2a4   :  { %p1230_p8 = scmp.ne.s32.totalorder %s1080_s11, 0 }
 0x2a6   :  { %1084 = shalt.err (%p1230_p8)  }
 0x2a7   :  { %1086 = vsyncmov [#allocation3 + $0x1] }
 0x2aa   :  { %s1087_s13 = vpop.sfrf %1086 }
 0x2ab   :  { %p1231_p6 = scmp.ne.s32.totalorder %s1087_s13, 0 }
 0x2ad   :  { %1091 = shalt.err (%p1231_p6)  }

</bundles_post_ra>
